<compile_context>
chip_gen: v5e
topology: v5e:2x2
jax: 0.10.0
libtpu: 0.0.40
codegen_flags: <defaults>
</compile_context>

<pallas_src>
import jax
import jax.numpy as jnp
from jax.experimental import pallas as pl
from jax.experimental.pallas import tpu as pltpu


def _round_up(n: int, m: int) -> int:
    return ((n + m - 1) // m) * m


def _fused_kernel_multi_k(x_ref, w_ref, b_ref, t_ref, o_ref, acc_ref):
    """Grid (B, C, H): MXU matmul accumulation + temperature-scale epilogue."""
    k = pl.program_id(2)

    @pl.when(k == 0)
    def _init():
        # Seed the accumulator with the bias so the finalize step is only the
        # temperature multiply.
        acc_ref[...] = jnp.broadcast_to(b_ref[...], acc_ref.shape)

    acc_ref[...] += jnp.dot(x_ref[...], w_ref[...],
                            preferred_element_type=jnp.float32)

    @pl.when(k == pl.num_programs(2) - 1)
    def _finalize():
        # logits / temperature == logits * (1/temperature); reciprocal runs on
        # the EUP slot (effectively free next to the MXU/VPU work).
        inv_t = pl.reciprocal(t_ref[...], approx=True)
        o_ref[...] = (acc_ref[...] * inv_t).astype(o_ref.dtype)


def _fused_kernel_single_k(x_ref, w_ref, b_ref, t_ref, o_ref):
    """Grid (B, C): H fits in one tile -> no scratch, no phase gates."""
    inv_t = pl.reciprocal(t_ref[...], approx=True)
    logits = jnp.dot(x_ref[...], w_ref[...],
                     preferred_element_type=jnp.float32) + b_ref[...]
    o_ref[...] = (logits * inv_t).astype(o_ref.dtype)


def temperature_scaler_forward(x, weight, bias, temperature, *,
                               tm_max=256, tn_max=256, tk_max=512):
    """Fused Linear(H->C) + temperature scaling.

    x: (B, H), weight: (H, C), bias: (1, C), temperature: (1, C).
    Returns f32 logits / temperature of shape (B, C).
    """
    B, H = x.shape
    Hw, C = weight.shape
    assert H == Hw
    assert bias.shape == (1, C)
    assert temperature.shape == (1, C)

    # Tile sizes: lane/MXU aligned (multiples of 128 on N/K, 16 sublanes for
    # bf16 on M), clamped for small problems.
    tm = _round_up(min(tm_max, _round_up(B, 16)), 8)
    tn = _round_up(min(tn_max, _round_up(C, 128)), 128)
    tk = _round_up(min(tk_max, _round_up(H, 128)), 128)

    B_pad = _round_up(B, tm)
    H_pad = _round_up(H, tk)
    C_pad = _round_up(C, tn)

    # bf16 operands for the MXU; bias / temperature / accumulator / output f32.
    x_p = jnp.pad(x.astype(jnp.bfloat16), ((0, B_pad - B), (0, H_pad - H)))
    w_p = jnp.pad(weight.astype(jnp.bfloat16),
                  ((0, H_pad - H), (0, C_pad - C)))
    b_p = jnp.pad(bias.astype(jnp.float32), ((0, 0), (0, C_pad - C)))
    # Pad temperature with ones so padded lanes stay finite (sliced off below).
    t_p = jnp.pad(temperature.astype(jnp.float32),
                  ((0, 0), (0, C_pad - C)), constant_values=1.0)

    gm, gn, gk = B_pad // tm, C_pad // tn, H_pad // tk

    cost = pl.CostEstimate(
        flops=2 * B_pad * H_pad * C_pad,
        transcendentals=C_pad,
        bytes_accessed=(x_p.size * 2 + w_p.size * 2 + b_p.size * 4
                        + t_p.size * 4 + B_pad * C_pad * 4),
    )

    if gk == 1:
        # Single K step: drop the reduction axis and the accumulator scratch.
        grid_spec = pltpu.PrefetchScalarGridSpec(
            num_scalar_prefetch=0,
            grid=(gm, gn),
            in_specs=[
                pl.BlockSpec((tm, tk), lambda i, j: (i, 0)),   # x
                pl.BlockSpec((tk, tn), lambda i, j: (0, j)),   # W
                pl.BlockSpec((1, tn), lambda i, j: (0, j)),    # bias
                pl.BlockSpec((1, tn), lambda i, j: (0, j)),    # temperature
            ],
            out_specs=pl.BlockSpec((tm, tn), lambda i, j: (i, j)),
        )
        kernel = _fused_kernel_single_k
        dim_sem = ("parallel", "parallel")
    else:
        grid_spec = pltpu.PrefetchScalarGridSpec(
            num_scalar_prefetch=0,
            grid=(gm, gn, gk),
            in_specs=[
                pl.BlockSpec((tm, tk), lambda i, j, k: (i, k)),   # x
                pl.BlockSpec((tk, tn), lambda i, j, k: (k, j)),   # W
                pl.BlockSpec((1, tn), lambda i, j, k: (0, j)),    # bias
                pl.BlockSpec((1, tn), lambda i, j, k: (0, j)),    # temperature
            ],
            out_specs=pl.BlockSpec((tm, tn), lambda i, j, k: (i, j)),
            scratch_shapes=[pltpu.VMEM((tm, tn), jnp.float32)],
        )
        kernel = _fused_kernel_multi_k
        dim_sem = ("parallel", "parallel", "arbitrary")

    out_padded = pl.pallas_call(
        kernel,
        out_shape=jax.ShapeDtypeStruct((B_pad, C_pad), jnp.float32),
        grid_spec=grid_spec,
        compiler_params=pltpu.CompilerParams(
            dimension_semantics=dim_sem,
            vmem_limit_bytes=32 * 1024 * 1024,
        ),
        cost_estimate=cost,
    )(x_p, w_p, b_p, t_p)

    return out_padded[:B, :C]


def _reference(x, weight, bias, temperature):
    # Pure-JAX reference using the same bf16 operand cast as the kernel.
    xb = x.astype(jnp.bfloat16).astype(jnp.float32)
    wb = weight.astype(jnp.bfloat16).astype(jnp.float32)
    logits = xb @ wb + bias
    return logits / jnp.broadcast_to(temperature, logits.shape)


if __name__ == "__main__":
    key = jax.random.PRNGKey(0)

    def run_case(case_id, B, H, C, **tile_kw):
        kx, kw, kb = jax.random.split(jax.random.fold_in(key, case_id), 3)
        x = jax.random.normal(kx, (B, H), dtype=jnp.float32)
        # Deterministic "wrapped model": Linear(H, C)
        weight = jax.random.normal(kw, (H, C), dtype=jnp.float32) * 0.1
        bias = jax.random.normal(kb, (1, C), dtype=jnp.float32) * 0.01
        # Temperature parameter init: torch.ones((1, C)) * 1.5
        temperature = jnp.ones((1, C), dtype=jnp.float32) * 1.5

        out = temperature_scaler_forward(x, weight, bias, temperature,
                                         **tile_kw)
        out = jax.block_until_ready(out)

        ref = _reference(x, weight, bias, temperature)
        assert out.shape == (B, C)
        assert jnp.allclose(out, ref, atol=2e-2, rtol=2e-2), \
            f"case {case_id}: mismatch vs reference"

    # Small shapes consistent with the module: logits (B, C), temperature (1, C).
    # Single-K-step path (no scratch).
    run_case(0, B=8, H=32, C=8)
    # Multi-step (B, C, H) grid + resident accumulator path.
    run_case(1, B=40, H=160, C=136, tm_max=16, tn_max=128, tk_max=128)

    print("KERNEL_OK")

    # TODO(synk): set_temperature (host-side LBFGS calibration of the
    # temperature parameter) is training logic, not part of forward; omitted.
</pallas_src>

<mosaic_0001>
module attributes {stable_mosaic.version = 11 : i64} {
  func.func @_fused_kernel_single_k(%arg0: i32, %arg1: i32, %arg2: memref<16x128xbf16, #tpu.memory_space<vmem>>, %arg3: memref<128x128xbf16, #tpu.memory_space<vmem>>, %arg4: memref<1x128xf32, #tpu.memory_space<vmem>>, %arg5: memref<1x128xf32, #tpu.memory_space<vmem>>, %arg6: memref<16x128xf32, #tpu.memory_space<vmem>>) attributes {dimension_semantics = [#tpu.dimension_semantics<parallel>, #tpu.dimension_semantics<parallel>], iteration_bounds = array<i64: 1, 1>, scalar_prefetch = 0 : i64, scratch_operands = 0 : i64, tpu.core_type = #tpu.core_type<tc>, window_params = [{transform_indices = @transform_0, window_bounds = array<i64: 16, 128>}, {transform_indices = @transform_1, window_bounds = array<i64: 128, 128>}, {transform_indices = @transform_2, window_bounds = array<i64: 1, 128>}, {transform_indices = @transform_3, window_bounds = array<i64: 1, 128>}, {transform_indices = @transform_4, window_bounds = array<i64: 16, 128>}]} {
    %c0 = arith.constant 0 : index
    %c0_0 = arith.constant 0 : index
    %0 = vector.load %arg5[%c0, %c0_0] : memref<1x128xf32, #tpu.memory_space<vmem>>, vector<1x128xf32>
    %1 = tpu.reciprocal %0 {approx = true} : vector<1x128xf32> -> vector<1x128xf32>
    %c0_1 = arith.constant 0 : index
    %c0_2 = arith.constant 0 : index
    %2 = vector.load %arg2[%c0_1, %c0_2] : memref<16x128xbf16, #tpu.memory_space<vmem>>, vector<16x128xbf16>
    %c0_3 = arith.constant 0 : index
    %c0_4 = arith.constant 0 : index
    %3 = vector.load %arg3[%c0_3, %c0_4] : memref<128x128xbf16, #tpu.memory_space<vmem>>, vector<128x128xbf16>
    %cst = arith.constant dense<0.000000e+00> : vector<16x128xf32>
    %4 = tpu.matmul %2, %3, %cst {dimension_numbers = #tpu.dot_dimension_numbers<[1], [0], [0], [1], [0, 0, 1, 1], [], []>} : vector<16x128xbf16>, vector<128x128xbf16>, vector<16x128xf32> -> vector<16x128xf32>
    %c0_5 = arith.constant 0 : index
    %c0_6 = arith.constant 0 : index
    %5 = vector.load %arg4[%c0_5, %c0_6] : memref<1x128xf32, #tpu.memory_space<vmem>>, vector<1x128xf32>
    %6 = vector.broadcast %5 : vector<1x128xf32> to vector<16x128xf32>
    %7 = arith.addf %4, %6 : vector<16x128xf32>
    %8 = vector.broadcast %1 : vector<1x128xf32> to vector<16x128xf32>
    %9 = arith.mulf %7, %8 : vector<16x128xf32>
    %c0_7 = arith.constant 0 : index
    %c0_8 = arith.constant 0 : index
    %10 = vector.load %arg6[%c0_7, %c0_8] : memref<16x128xf32, #tpu.memory_space<vmem>>, vector<16x128xf32>
    tpu.vector_store %arg6[%c0_7, %c0_8], %9 {strides = array<i32>} : memref<16x128xf32, #tpu.memory_space<vmem>>, vector<16x128xf32>,
    return
  }
  func.func @transform_0(%arg0: i32, %arg1: i32) -> (i32, i32) {
    %c0_i32 = arith.constant 0 : i32
    %c0_i32_0 = arith.constant 0 : i32
    return %arg0, %c0_i32 : i32, i32
  }
  func.func @transform_1(%arg0: i32, %arg1: i32) -> (i32, i32) {
    %c0_i32 = arith.constant 0 : i32
    %c0_i32_0 = arith.constant 0 : i32
    return %c0_i32, %arg1 : i32, i32
  }
  func.func @transform_2(%arg0: i32, %arg1: i32) -> (i32, i32) {
    %c0_i32 = arith.constant 0 : i32
    %c0_i32_0 = arith.constant 0 : i32
    return %c0_i32, %arg1 : i32, i32
  }
  func.func @transform_3(%arg0: i32, %arg1: i32) -> (i32, i32) {
    %c0_i32 = arith.constant 0 : i32
    %c0_i32_0 = arith.constant 0 : i32
    return %c0_i32, %arg1 : i32, i32
  }
  func.func @transform_4(%arg0: i32, %arg1: i32) -> (i32, i32) {
    %c0_i32 = arith.constant 0 : i32
    return %arg0, %arg1 : i32, i32
  }
}

</mosaic_0001>

<bundles_post_ra>
// kernel: tpu_custom_call.1
= control target key start
LH: loop header
LB: loop body
LE: loop exit
PB: predicated region body
PF: predicated region fallthrough
CT: control target
= control target key end

     0   :  { %9 = vsyncpa [#allocation3], 0  ;;  %s349_s0 = inlined_call_operand.hbm [shape: bf16[16,128], index: 0, kind: input, shape index: {}]   ;;  %s350_s1 = inlined_call_operand.hbm [shape: bf16[128,128], index: 1, kind: input, shape index: {}]   ;;  %s351_s2 = inlined_call_operand.vmem [shape: f32[1,128], index: 2, kind: input, shape index: {}]   ;;  %s352_s3 = inlined_call_operand.vmem [shape: f32[1,128], index: 3, kind: input, shape index: {}]   ;;  %s353_s4 = inlined_call_operand.hbm [shape: f32[16,128], index: 4, kind: output, shape index: {}]  }
   0x1   :  { %10 = vsyncpa [#allocation6], 0 }
   0x2   :  { %11 = vsyncpa [#allocation4], 0  ;;  %s16_s17 = sshll.u32 %s349_s0, 4  ;;  %s302_s18 = smov [#allocation2]   ;;  %s17_s17 = int_to_ptr.hbm [resolvable:$true] %s16_s17 }
   0x3   :  { %s18_s19 = sshll.u32 %s302_s18, 4  ;;  %s29_s22 = sshll.u32 %s350_s1, 4  ;;  %s19_s19 = int_to_ptr.vmem [resolvable:$true] %s18_s19  ;;  %s30_s22 = int_to_ptr.hbm [resolvable:$true] %s29_s22 }
   0x4   :  { %s303_s23 = smov 64   ;;  %s304_s24 = smov 4  }
   0x5   :  { %24 = dma.hbm_to_vmem [thread:$0]  %s17_s17, 128, %s19_s19, [#allocation3], %s303_s23, %s303_s23, %s304_s24  }
   0x6   :  { %s305_s25 = smov [#allocation5]  }
   0x7   :  { %s31_s26 = sshll.u32 %s305_s25, 4  ;;  %s32_s26 = int_to_ptr.vmem [resolvable:$true] %s31_s26 }
   0x8   :  { %37 = dma.hbm_to_vmem [thread:$0]  %s30_s22, 1024, %s32_s26, [#allocation6], %s303_s23, %s303_s23, %s304_s24  }
   0x9   :  { %296 = dma.done.wait [#allocation3], 128  }
   0xa   :  { %297 = vsyncadd [#allocation3], 4294967168 }
   0xb   :  { %298 = dma.done.wait [#allocation6], 1024  }
   0xc   :  { %299 = vsyncadd [#allocation6], 4294966272  ;;  %v213_v0 = vld [vmem:[#allocation5 + $0x38] sm:$0xff]  ;;  %v212_v1 = vld [vmem:[#allocation5 + $0x30] sm:$0xff]  ;;  %s306_s29 = smov [#allocation7]   ;;  %s155_s7 = sshll.u32 %s353_s4, 4  ;;  %s156_s7 = int_to_ptr.hbm [resolvable:$true] %s155_s7 }
   0xd   :  { %128 = vmatpush.bf16.msra.mxu0 %v213_v0  ;;  %v211_v2 = vld [vmem:[#allocation5 + $0x28] sm:$0xff]  ;;  %v210_v3 = vld [vmem:[#allocation5 + $0x20] sm:$0xff]  ;;  %v209_v4 = vld [vmem:[#allocation5 + $0x18] sm:$0xff]  ;;  %s153_s30 = sshll.u32 %s306_s29, 4  ;;  %s308_s8 = smov 8   ;;  %s154_s30 = int_to_ptr.vmem [resolvable:$true] %s153_s30 }
   0xe   :  { %v208_v5 = vld [vmem:[#allocation5 + $0x10] sm:$0xff]  ;;  %v207_v6 = vld [vmem:[#allocation5 + $0x8] sm:$0xff]  ;;  %v206_v7 = vld [vmem:[#allocation5] sm:$0xff] }
   0xf   :  { %v205_v8 = vld [vmem:[#allocation2] sm:$0xff] }
  0x10   :  { %v50_v9 = vld [vmem:[%s352_s3] sm:$0x1]  ;;  %s307_s3 = smov 128  }
  0x11   :  { %129 = vmatpush.bf16.msra.mxu0 %v212_v1  ;;  %222 = vrcp.f32 %v50_v9  ;;  %v221_v11 = vld [vmem:[%s351_s2] ss:$0 sm:$0xff] }
  0x15   :  { %130 = vmatpush.bf16.msra.mxu0 %v211_v2 }
  0x17   :  { %v223_v10 = vpop.eup %222 }
  0x18   :  { %v143_v12 = vperm.slane %v223_v10, 0 }
  0x19   :  { %131 = vmatpush.bf16.msra.mxu0 %v210_v3 }
  0x1d   :  { %132 = vmatpush.bf16.msra.mxu0 %v209_v4 }
  0x21   :  { %133 = vmatpush.bf16.msra.mxu0 %v208_v5 }
  0x25   :  { %134 = vmatpush.bf16.msra.mxu0 %v207_v6 }
  0x29   :  { %135 = vmatpush.bf16.msra.mxu0 %v206_v7 }
  0x2c   :  { %136 = vmatmul.bf16.vlgmr.msra.gmra.mxu0 %v205_v8 }
  0xa9   :  { %v137_v13 = vpop.f32.mrf.mxu0 }
  0xaa   :  { %v138_v14 = vadd.f32 %v221_v11, %v137_v13 }
  0xac   :  { %v145_v15 = vmul.f32 %v143_v12, %v138_v14 }
  0xae   :  { %147 = vst [vmem:[#allocation7] sm:$0xff] %v145_v15 }
  0xb1   :  { %v139_v16 = vpop.f32.mrf.mxu0 }
  0xb2   :  { %v140_v17 = vadd.f32 %v221_v11, %v139_v16 }
  0xb4   :  { %v146_v18 = vmul.f32 %v143_v12, %v140_v17 }
  0xb6   :  { %148 = vst [vmem:[#allocation7 + $0x8] sm:$0xff] %v146_v18 }
  0xb7   :  { %161 = dma.vmem_to_hbm [thread:$0]  %s154_s30, 256, %s156_s7, [#allocation4], %s307_s3, %s307_s3, %s308_s8  }
  0xb8   :  { %300 = dma.done.wait [#allocation4], 256  }
  0xb9   :  { %301 = vsyncadd [#allocation4], 4294967040 }
  0xba   :  { %166 = vsyncpa [#allocation3], 1 }
  0xbb   :  { %167 = vsyncpa [#allocation6], 1 }
  0xbc   :  { %168 = vsyncpa [#allocation4], 1 }

</bundles_post_ra>
